<compile_context>
chip_gen: v7x
topology: tpu7x:2x2x1
jax: 0.10.0
libtpu: 0.0.40
codegen_flags: <defaults>
</compile_context>

<pallas_src>
import functools

import jax
import jax.numpy as jnp
from jax.experimental import pallas as pl
from jax.experimental.pallas import tpu as pltpu

BN_EPS = 1e-5
LANE = 128
SUBLANE = 8            # activations stay f32 in VMEM -> 8-row sublane tile
MAX_BATCH_TILE = 256   # fills 256-wide MXU on v6e/v7x; fine on v5e too


def _asl_block_kernel(x_ref, w_ref, b_ref, o_ref):
    # x_ref: (TB, F) f32       (input activations, used only at block 0)
    # w_ref: (F, F)  bf16      (folded weight of current block, leading dim squeezed)
    # b_ref: (1, F)  f32       (folded bias of current block)
    # o_ref: (TB, F) f32       (resident activation accumulator / final output)
    k = pl.program_id(1)

    @pl.when(k == 0)
    def _():
        o_ref[...] = x_ref[...]

    h = o_ref[...]
    z = jnp.dot(h.astype(jnp.bfloat16), w_ref[...],
                preferred_element_type=jnp.float32)
    o_ref[...] = jnp.maximum(z + b_ref[...], 0.0).astype(o_ref.dtype)


def fold_and_pad_params(params, feat_pad=LANE):
    """Fold eval-mode BN into (W', b'), zero-pad feature dims to `feat_pad`,
    stack blocks into (nb, F, F) bf16 / (nb, 1, F) f32 (done once, offline)."""
    nb = len(params)
    F = feat_pad
    w_stack = jnp.zeros((nb, F, F), jnp.float32)
    b_stack = jnp.zeros((nb, 1, F), jnp.float32)
    for i, (w, b, gamma, beta, rmean, rvar) in enumerate(params):
        in_f, out_f = w.shape
        assert in_f <= F and out_f <= F, (in_f, out_f, F)
        scale = gamma * jax.lax.rsqrt(rvar + BN_EPS)          # (out_f,)
        w_f = w * scale[None, :]                              # fold BN into columns
        b_f = (b - rmean) * scale + beta
        # Zero padding keeps padded columns at 0 after ReLU and padded input
        # rows/cols contribute nothing, so the chained result is unchanged.
        w_stack = w_stack.at[i, :in_f, :out_f].set(w_f)
        b_stack = b_stack.at[i, 0, :out_f].set(b_f)
    return w_stack.astype(jnp.bfloat16), b_stack


@functools.partial(jax.jit, static_argnames=("num_classes",))
def asl_forward_fused(x, w_stack, b_stack, *, num_classes):
    """(Linear + BN(eval) + ReLU + Dropout(eval)) x num_blocks in one pallas_call."""
    B, in_f = x.shape
    nb, F, _ = w_stack.shape

    # Batch tiling: round to the f32 sublane tile, cap the tile at MAX_BATCH_TILE,
    # then round the padded batch up to a whole number of tiles.
    Bp = ((B + SUBLANE - 1) // SUBLANE) * SUBLANE
    TB = Bp if Bp <= MAX_BATCH_TILE else MAX_BATCH_TILE
    Bp = ((Bp + TB - 1) // TB) * TB
    x_pad = jnp.pad(x.astype(jnp.float32), ((0, Bp - B), (0, F - in_f)))

    flops = 2 * Bp * F * F * nb
    bytes_accessed = (Bp * F * 4                 # x in
                      + nb * F * F * 2           # bf16 weights
                      + nb * F * 4               # biases
                      + Bp * F * 4)              # output

    out = pl.pallas_call(
        _asl_block_kernel,
        out_shape=jax.ShapeDtypeStruct((Bp, F), jnp.float32),
        grid=(Bp // TB, nb),
        in_specs=[
            # activations: one batch tile, constant across the block axis
            pl.BlockSpec((TB, F), lambda b, k: (b, 0)),
            # folded weights: stream one (F, F) block per grid step along k
            pl.BlockSpec((pl.Squeezed(), F, F), lambda b, k: (k, 0, 0)),
            # folded biases: stream one (1, F) block per grid step along k
            pl.BlockSpec((pl.Squeezed(), 1, F), lambda b, k: (k, 0, 0)),
        ],
        # output block constant across k -> resident accumulator across the chain
        out_specs=pl.BlockSpec((TB, F), lambda b, k: (b, 0)),
        compiler_params=pltpu.CompilerParams(
            dimension_semantics=("parallel", "arbitrary")),
        cost_estimate=pl.CostEstimate(flops=flops, transcendentals=0,
                                      bytes_accessed=bytes_accessed),
    )(x_pad, w_stack, b_stack)
    return out[:B, :num_classes]


def make_asl_params(in_features, first_out_features, num_classes, num_blocks,
                    key):
    """Deterministic parameter init mirroring the PyTorch module's shapes."""
    params = []
    out_features = first_out_features
    for idx in range(num_blocks):
        if idx == num_blocks - 1:
            out_features = num_classes
        key, kw, kb = jax.random.split(key, 3)
        bound = 1.0 / jnp.sqrt(jnp.float32(in_features))
        w = jax.random.uniform(kw, (in_features, out_features),
                               minval=-bound, maxval=bound, dtype=jnp.float32)
        b = jax.random.uniform(kb, (out_features,),
                               minval=-bound, maxval=bound, dtype=jnp.float32)
        # BatchNorm1d default init / running stats: weight=1, bias=0, mean=0, var=1
        gamma = jnp.ones((out_features,), jnp.float32)
        beta = jnp.zeros((out_features,), jnp.float32)
        rmean = jnp.zeros((out_features,), jnp.float32)
        rvar = jnp.ones((out_features,), jnp.float32)
        params.append((w, b, gamma, beta, rmean, rvar))
        in_features = out_features
        out_features = out_features // 2
    return params


def asl_reference(x, params):
    """Pure-JAX f32 reference (unfolded BN, eval mode) for correctness checking."""
    for (w, b, gamma, beta, rmean, rvar) in params:
        z = x @ w + b
        y = (z - rmean) * (gamma / jnp.sqrt(rvar + BN_EPS)) + beta
        x = jnp.maximum(y, 0.0)
    return x


if __name__ == "__main__":
    # Module-consistent small shapes:
    #   in_features=32, first_out_features=64, num_classes=16, num_blocks=3
    #   -> layer dims 32 -> 64 -> 32 -> 16
    in_features = 32
    first_out_features = 64
    num_classes = 16
    num_blocks = 3
    batch = 16

    key = jax.random.PRNGKey(0)
    key, kx = jax.random.split(key)
    x = jax.random.normal(kx, (batch, in_features), dtype=jnp.float32)

    params = make_asl_params(in_features, first_out_features, num_classes,
                             num_blocks, key)
    w_stack, b_stack = fold_and_pad_params(params)

    out = asl_forward_fused(x, w_stack, b_stack, num_classes=num_classes)
    out = jax.block_until_ready(out)

    ref = asl_reference(x, params)
    assert out.shape == (batch, num_classes), out.shape
    # bf16 weights/activations at the MXU (f32 accumulation) -> loosened tolerance.
    assert jnp.allclose(out, ref, atol=3e-2, rtol=3e-2), (
        float(jnp.max(jnp.abs(out - ref))))

    print("KERNEL_OK")
</pallas_src>

<mosaic_0001>
module attributes {stable_mosaic.version = 11 : i64} {
  func.func @_asl_block_kernel(%arg0: i32, %arg1: i32, %arg2: memref<16x128xf32, #tpu.memory_space<vmem>>, %arg3: memref<1x128x128xbf16, #tpu.memory_space<vmem>>, %arg4: memref<1x1x128xf32, #tpu.memory_space<vmem>>, %arg5: memref<16x128xf32, #tpu.memory_space<vmem>>) attributes {dimension_semantics = [#tpu.dimension_semantics<parallel>, #tpu.dimension_semantics<arbitrary>], iteration_bounds = array<i64: 1, 3>, scalar_prefetch = 0 : i64, scratch_operands = 0 : i64, tpu.core_type = #tpu.core_type<tc>, window_params = [{transform_indices = @transform_0, window_bounds = array<i64: 16, 128>}, {transform_indices = @transform_1, window_bounds = array<i64: 1, 128, 128>}, {transform_indices = @transform_2, window_bounds = array<i64: 1, 1, 128>}, {transform_indices = @transform_3, window_bounds = array<i64: 16, 128>}]} {
    %c0_i32 = arith.constant 0 : i32
    %0 = arith.cmpi eq, %arg1, %c0_i32 : i32
    %1 = arith.extui %0 : i1 to i32
    %c0_i32_0 = arith.constant 0 : i32
    %2 = arith.cmpi ne, %1, %c0_i32_0 : i32
    scf.if %2 {
      %c0_11 = arith.constant 0 : index
      %c0_12 = arith.constant 0 : index
      %15 = vector.load %arg2[%c0_11, %c0_12] : memref<16x128xf32, #tpu.memory_space<vmem>>, vector<16x128xf32>
      %c0_13 = arith.constant 0 : index
      %c0_14 = arith.constant 0 : index
      %16 = vector.load %arg5[%c0_13, %c0_14] : memref<16x128xf32, #tpu.memory_space<vmem>>, vector<16x128xf32>
      tpu.vector_store %arg5[%c0_13, %c0_14], %15 {strides = array<i32>} : memref<16x128xf32, #tpu.memory_space<vmem>>, vector<16x128xf32>,
    } else {
    }
    %c0 = arith.constant 0 : index
    %c0_1 = arith.constant 0 : index
    %3 = vector.load %arg5[%c0, %c0_1] : memref<16x128xf32, #tpu.memory_space<vmem>>, vector<16x128xf32>
    %4 = arith.truncf %3 : vector<16x128xf32> to vector<16x128xbf16>
    %c0_2 = arith.constant 0 : index
    %c0_3 = arith.constant 0 : index
    %c0_4 = arith.constant 0 : index
    %5 = vector.load %arg3[%c0_2, %c0_3, %c0_4] : memref<1x128x128xbf16, #tpu.memory_space<vmem>>, vector<1x128x128xbf16>
    %6 = vector.shape_cast %5 : vector<1x128x128xbf16> to vector<128x128xbf16>
    %cst = arith.constant dense<0.000000e+00> : vector<16x128xf32>
    %7 = tpu.matmul %4, %6, %cst {dimension_numbers = #tpu.dot_dimension_numbers<[1], [0], [0], [1], [0, 0, 1, 1], [], []>} : vector<16x128xbf16>, vector<128x128xbf16>, vector<16x128xf32> -> vector<16x128xf32>
    %c0_5 = arith.constant 0 : index
    %c0_6 = arith.constant 0 : index
    %c0_7 = arith.constant 0 : index
    %8 = vector.load %arg4[%c0_5, %c0_6, %c0_7] : memref<1x1x128xf32, #tpu.memory_space<vmem>>, vector<1x1x128xf32>
    %9 = vector.shape_cast %8 : vector<1x1x128xf32> to vector<1x128xf32>
    %10 = vector.broadcast %9 : vector<1x128xf32> to vector<16x128xf32>
    %11 = arith.addf %7, %10 : vector<16x128xf32>
    %cst_8 = arith.constant 0.000000e+00 : f32
    %12 = vector.broadcast %cst_8 : f32 to vector<16x128xf32>
    %13 = arith.maximumf %11, %12 : vector<16x128xf32>
    %c0_9 = arith.constant 0 : index
    %c0_10 = arith.constant 0 : index
    %14 = vector.load %arg5[%c0_9, %c0_10] : memref<16x128xf32, #tpu.memory_space<vmem>>, vector<16x128xf32>
    tpu.vector_store %arg5[%c0_9, %c0_10], %13 {strides = array<i32>} : memref<16x128xf32, #tpu.memory_space<vmem>>, vector<16x128xf32>,
    return
  }
  func.func @transform_0(%arg0: i32, %arg1: i32) -> (i32, i32) {
    %c0_i32 = arith.constant 0 : i32
    %c0_i32_0 = arith.constant 0 : i32
    return %arg0, %c0_i32 : i32, i32
  }
  func.func @transform_1(%arg0: i32, %arg1: i32) -> (i32, i32, i32) {
    %c0_i32 = arith.constant 0 : i32
    %c0_i32_0 = arith.constant 0 : i32
    %c0_i32_1 = arith.constant 0 : i32
    return %arg1, %c0_i32, %c0_i32_0 : i32, i32, i32
  }
  func.func @transform_2(%arg0: i32, %arg1: i32) -> (i32, i32, i32) {
    %c0_i32 = arith.constant 0 : i32
    %c0_i32_0 = arith.constant 0 : i32
    %c0_i32_1 = arith.constant 0 : i32
    return %arg1, %c0_i32, %c0_i32_0 : i32, i32, i32
  }
  func.func @transform_3(%arg0: i32, %arg1: i32) -> (i32, i32) {
    %c0_i32 = arith.constant 0 : i32
    %c0_i32_0 = arith.constant 0 : i32
    return %arg0, %c0_i32 : i32, i32
  }
}

</mosaic_0001>

<bundles_post_ra>
// kernel: asl_forward_fused.1
= control target key start
LH: loop header
LB: loop body
LE: loop exit
PB: predicated region body
PF: predicated region fallthrough
CT: control target
= control target key end

     0   :  { %8 = vsyncpa [#allocation3], 0  ;;  %s904_s0 = inlined_call_operand.vmem [shape: f32[16,128], index: 0, kind: input, shape index: {}]   ;;  %s905_s1 = inlined_call_operand.hbm [shape: bf16[3,128,128], index: 1, kind: input, shape index: {}]   ;;  %s906_s2 = inlined_call_operand.vmem [shape: f32[3,1,128], index: 2, kind: input, shape index: {}]   ;;  %s907_s3 = inlined_call_operand.hbm [shape: f32[16,128], index: 3, kind: output, shape index: {}]  }
   0x1   :  { %10 = vsyncpa [#allocation3 + $0x1], 0 }
   0x2   :  { %11 = vsyncpa [#allocation4], 0  ;;  %s725_s12 = smov 0   ;;  %s727_s13 = smov 0  }
   0x3   :  { %s729_s14 = smov 0   ;;  %s731_s15 = smov 0  }
   0x4   :  { %s733_s16 = smov 0   ;;  %s735_s17 = smov 0  }
   0x5 LB: > { %s456_s18 = sadd.s32 4294967295, %s695_s17   ;;  %s26_s19 = sadd.s32 1, %s691_s16  ;;  %s695_s17 = sphi %s735_s17, %s17_s17   ;;  %s691_s16 = sphi %s733_s16, %s916_s16   ;;  %s687_s15 = sphi %s731_s15, %s915_s15   ;;  %s683_s14 = sphi %s729_s14, %s914_s14   ;;  %s679_s13 = sphi %s727_s13, %s913_s13   ;;  %s675_s12 = sphi %s725_s12, %s912_s12  }
   0x6   : > { %p27_p0 = scmp.ge.s32.totalorder %s26_s19, 3  ;;  %s62_s20 = sadd.s32 1, %s683_s14 }
   0x7   : > { %p69_p1 = scmp.ne.s32.totalorder %s683_s14, %s679_s13  ;;  %p70_p2 = scmp.eq.s32.totalorder %s695_s17, 0 }
   0x8   : > { %s918_s19 = smov (%p27_p0, %s26_s19), 0  ;;  %p75_p4 = scmp.ne.s32.totalorder %s679_s13, %s675_s12 }
   0x9   : > { %p761_p3 = por %p70_p2, %p69_p1  ;;  %s59_s22 = ssub.s32 %s691_s16, %s918_s19 }
   0xa   : > { %p76_p5 = scmp.eq.s32.totalorder %s456_s18, 0  ;;  %p60_p6 = scmp.eq.s32.totalorder %s59_s22, 0 }
   0xb   : > { %p519_p8 = scmp.lt.s32.totalorder %s695_s17, 3  ;;  %s160_s25 = sand.u32 1, %s683_s14  }
   0xc   : > { %p770_p7 = por %p76_p5, %p75_p4  ;;  %s479_s26 = sshll.u32 %s691_s16, 10 }
   0xd   : > { %s776_s24 = scalar_select %p60_p6, %s683_s14, %s62_s20  }
   0xe   : > { %s460_s27 = sshll.u32 %s160_s25, 6  ;;  %s783_s30 = scalar_lea.hbm %s905_s1, %s479_s26 }
   0xf   : > { %s164_s4 = scalar_lea.vmem [#allocation2], %s460_s27  ;;  %p787_p9 = pnand %p519_p8, %p761_p3 }
  0x10   : > { %s171_s5 = sshll.u32 %s164_s4, 4  ;;  %s793_s7 = scalar_lea.sflag [#allocation3], %s160_s25  ;;  %s791_s5 = int_to_ptr.vmem [resolvable:$true] %s171_s5 }
  0x11   : > { %s585_s8 = scalar_lea.hbm %s783_s30, 1024  ;;  %p587_p11 = pneg %p787_p9 }
  0x12   : > { %p586_p10 = scmp.ne.s32.totalorder %s783_s30, %s585_s8  ;;  %s590_s11 = scalar_lea.hbm %s905_s1, 3072 }
  0x13   : > { %p591_p0 = scmp.lt.u32.totalorder %s783_s30, %s905_s1  ;;  %p592_p1 = scmp.lt.u32.totalorder %s590_s11, %s585_s8 }
  0x14   : > { %p588_p12 = pnand %p587_p11, %p586_p10  ;;  %p594_p3 = scmp.lt.u32.totalorder %s585_s8, %s783_s30 }
  0x15   : > { %p593_p2 = por %p592_p1, %p591_p0 }
  0x16   : > { %p589_p13 = pneg %p588_p12 }
  0x17   : > { %p595_p4 = por %p594_p3, %p593_p2 }
  0x19   : > { %p596_p5 = pnand %p595_p4, %p589_p13 }
  0x1b   : > { %599 = shalt.err (!%p596_p5)
}
  0x1c   : > { %s600_s21 = scalar_lea.vmem %s791_s5, 1024  ;;  %s697_s22 = smov [#allocation2]  }
  0x1d   : > { %p601_p6 = scmp.ne.s32.totalorder %s791_s5, %s600_s21  ;;  %s605_s25 = sshll.u32 %s697_s22, 4  ;;  %s606_s25 = int_to_ptr.vmem [resolvable:$false] %s605_s25 }
  0x1e   : > { %s607_s26 = scalar_lea.vmem %s606_s25, 2048  ;;  %p608_p12 = scmp.lt.s32.totalorder %s791_s5, %s606_s25 }
  0x1f   : > { %p603_p8 = pnand %p601_p6, %p587_p11  ;;  %p609_p0 = scmp.lt.s32.totalorder %s607_s26, %s600_s21 }
  0x21   : > { %p604_p10 = pneg %p603_p8  ;;  %p610_p1 = por %p609_p0, %p608_p12 }
  0x23   : > { %p611_p2 = pnand %p610_p1, %p604_p10 }
  0x25   : > { %614 = shalt.err (!%p611_p2)
}
  0x26   : > { %s698_s27 = smov 64   ;;  %s699_s28 = smov 4  }
  0x27   : > { %518 = dma.hbm_to_vmem [thread:$0]  (!%p787_p9), %s783_s30, 1024, %s791_s5, %s793_s7, %s698_s27, %s698_s27, %s699_s28  }
  0x28   : > { %p463_p11 = scmp.ge.s32.totalorder %s695_s17, 1  ;;  %p185_p13 = scmp.lt.s32.totalorder %s695_s17, 4 }
  0x2a   : > { %p186_p3 = pnand %p463_p11, %p185_p13 }
  0x2b   : > { %s191_s29 = sand.u32 (!%p186_p3), 1, %s679_s13  }
  0x2c   : > { %189 = sbr.rel (%p186_p3) target bundleno = 329 (0x149), region = 32  ;;  %s464_s4 = sshll.u32 (!%p186_p3), %s191_s29, 6 }
  0x2d   : > { %s192_s8 = scalar_lea.sflag (!%p186_p3), [#allocation3], %s191_s29  ;;  %s824_s9 = scalar_lea.vmem (!%p186_p3), [#allocation2], %s464_s4 }
  0x33   : > { %666 = dma.done.wait (%p770_p7), %s192_s8, 1024  }
  0x34   : > { %668 = vsyncadd (%p770_p7), %s192_s8, 4294966272  ;;  %p227_p4 = scmp.lt.s32.totalorder %s687_s15, 2  ;;  %p465_p9 = scmp.ne.s32.totalorder %s687_s15, 0 }
  0x35   : > { %v236_v0 = vld [vmem:[%s904_s0] sm:$0xff] (!%p465_p9)  ;;  %v237_v1 = vld [vmem:[%s904_s0 + $0x8] sm:$0xff] (!%p465_p9) }
  0x36   : > { %s832_s30 = scalar_select %p227_p4, %s687_s15, 2 }
  0x37   : > { %235 = sbr.rel (%p465_p9) target bundleno = 62 (0x3e), region = 40  ;;  %238 = vst [vmem:[#allocation5] sm:$0xff] (!%p465_p9), %v236_v0  ;;  %239 = vst [vmem:[#allocation5 + $0x8] sm:$0xff] (!%p465_p9), %v237_v1 }
  0x38   : > { %s229_s7 = scalar_lea.vmem %s906_s2, %s832_s30 }
  0x3e PF: > { %v577_v2 = vld [vmem:[%s824_s9] sm:$0xff]   ;;  %v700_v3 = vmov 0.0   ;;  %v578_v4 = vld [vmem:[%s824_s9 + $0x8] sm:$0xff]   ;;  %vm701_vm0 = vmmov 0   ;;  %v579_v5 = vld [vmem:[%s824_s9 + $0x10] sm:$0xff]   ;;  %s702_s21 = smov [#allocation5]  }
  0x3f   : > { %489 = vmatprep.subr.bf16.mxu0 %v700_v3  ;;  %505 = vmatprep.mubr.msk.bf16.mxu0 %vm701_vm0, %v700_v3  ;;  %v580_v6 = vld [vmem:[%s824_s9 + $0x18] sm:$0xff]   ;;  %v581_v7 = vld [vmem:[%s824_s9 + $0x20] sm:$0xff]   ;;  %v582_v8 = vld [vmem:[%s824_s9 + $0x28] sm:$0xff]   ;;  %s368_s22 = sshll.u32 %s702_s21, 4  ;;  %p860_p7 = scmp.eq.s32.totalorder %s456_s18, 2  ;;  %s369_s22 = int_to_ptr.vmem [resolvable:$true] %s368_s22 }
  0x40   : > { %490 = vmatpush3.bf16.msra.mxu0 %v577_v2  ;;  %v583_v9 = vld [vmem:[%s824_s9 + $0x30] sm:$0xff]   ;;  %v584_v10 = vld [vmem:[%s824_s9 + $0x38] sm:$0xff]   ;;  %v240_v11 = vld [vmem:[#allocation5] sm:$0xff]  ;;  %s615_s26 = scalar_lea.vmem %s369_s22, 256  ;;  %p622_p10 = scmp.lt.s32.totalorder %s369_s22, %s369_s22 }
  0x41   : > { %491 = vmatprep.subr.bf16.mxu0 %v700_v3  ;;  %v241_v12 = vld [vmem:[#allocation5 + $0x8] sm:$0xff]  ;;  %v466_v14 = vld [vmem:[%s229_s7] ss:$0 sm:$0xff]  ;;  %p616_p5 = scmp.ne.s32.totalorder %s369_s22, %s615_s26  ;;  %p623_p12 = scmp.lt.s32.totalorder %s615_s26, %s615_s26 }
  0x42   : > { %v242_v13 = vpack.c.bf16 %v241_v12, %v240_v11 }
  0x43   : > { %p617_p6 = pnand %p616_p5, %p860_p7  ;;  %p624_p0 = por %p623_p12, %p622_p10 }
  0x44   : > { %492 = vmatpush3.bf16.msra.mxu0 %v578_v4 }
  0x45   : > { %493 = vmatprep.subr.bf16.mxu0 %v700_v3  ;;  %p618_p8 = pneg %p617_p6 }
  0x47   : > { %p625_p1 = pnand %p624_p0, %p618_p8 }
  0x48   : > { %494 = vmatpush3.bf16.msra.mxu0 %v579_v5 }
  0x49   : > { %495 = vmatprep.subr.bf16.mxu0 %v700_v3 }
  0x4c   : > { %496 = vmatpush3.bf16.msra.mxu0 %v580_v6 }
  0x4d   : > { %497 = vmatprep.subr.bf16.mxu0 %v700_v3 }
  0x50   : > { %498 = vmatpush3.bf16.msra.mxu0 %v581_v7 }
  0x51   : > { %499 = vmatprep.subr.bf16.mxu0 %v700_v3 }
  0x54   : > { %500 = vmatpush3.bf16.msra.mxu0 %v582_v8 }
  0x55   : > { %501 = vmatprep.subr.bf16.mxu0 %v700_v3 }
  0x58   : > { %502 = vmatpush3.bf16.msra.mxu0 %v583_v9 }
  0x59   : > { %503 = vmatprep.subr.bf16.mxu0 %v700_v3 }
  0x5c   : > { %504 = vmatpush3.bf16.msra.mxu0 %v584_v10 }
  0x5f   : > { %506 = vmatmul.mubr.bf16.vlgmr.msra.gmra.mrb[0].mxu0 %v242_v13 }
 0x132   : > { %v348_v15 = vpop.f32.mrb[0].mxu0 }
 0x133   : > { %v349_v16 = vadd.f32 %v466_v14, %v348_v15  ;;  %v507_v17 = vpop.f32.mrb[1].mxu0 }
 0x134   : > { %v351_v18 = vpop.f32.mrb[2].mxu0 }
 0x135   : > { %v355_v19 = vmax.f32 %v349_v16, 0.0  ;;  %v352_v20 = vadd.f32 %v466_v14, %v351_v18  ;;  %v508_v21 = vpop.f32.mrb[3].mxu0 }
 0x137   : > { %357 = vst [vmem:[#allocation5] sm:$0xff] %v355_v19  ;;  %v356_v22 = vmax.f32 %v352_v20, 0.0 }
 0x139   : > { %358 = vst [vmem:[#allocation5 + $0x8] sm:$0xff] %v356_v22 }
 0x13a   : > { %628 = shalt.err (!%p625_p1)
}
 0x13b   : > { %s629_s28 = scalar_lea.hbm %s907_s3, 256 }
 0x13c   : > { %p630_p2 = scmp.ne.s32.totalorder %s907_s3, %s629_s28  ;;  %p635_p3 = scmp.lt.u32.totalorder %s629_s28, %s907_s3 }
 0x13e   : > { %p631_p11 = pnand %p630_p2, %p860_p7 }
 0x140   : > { %p632_p13 = pneg %p631_p11 }
 0x142   : > { %p637_p4 = pnand %p635_p3, %p632_p13 }
 0x144   : > { %640 = shalt.err (!%p637_p4)
}
 0x145   : > { %s703_s30 = smov 128   ;;  %s704_s5 = smov 8  }
 0x146   : > { %512 = dma.vmem_to_hbm [thread:$0]  (%p860_p7), %s369_s22, 256, %s907_s3, [#allocation4], %s703_s30, %s703_s30, %s704_s5  }
 0x147   : > { %670 = dma.done.wait (%p860_p7), [#allocation4], 256  }
 0x148   : > { %672 = vsyncadd (%p860_p7), [#allocation4], 4294967040 }
 0x149 PF: > { %s17_s17 = sadd.s32 1, %s695_s17   ;;  %s912_s12 = smov %s679_s13 }
 0x14a   : > { %p14_p9 = scmp.ge.s32.totalorder %s17_s17, 5   ;;  %s913_s13 = smov %s683_s14 }
 0x14b   : > { %s914_s14 = smov %s776_s24  ;;  %s915_s15 = smov %s691_s16 }
 0x14c   : > { %s916_s16 = smov %s918_s19  ;;  %16 = sbr.rel (!%p14_p9) target bundleno = 5 (0x5), region = 80 }
 0x153   :  { %384 = vsyncpa [#allocation3], 1 }
 0x154   :  { %386 = vsyncpa [#allocation3 + $0x1], 1 }
 0x155   :  { %387 = vsyncpa [#allocation4], 1 }
 0x156   :  { %389 = vsyncpa [#allocation4 + $0x1], 1 }

</bundles_post_ra>
